<compile_context>
chip_gen: v5e
topology: v5e:2x2
jax: 0.10.0
libtpu: 0.0.40
codegen_flags: <defaults>
</compile_context>

<pallas_src>
import functools

import jax
import jax.numpy as jnp
from jax.experimental import pallas as pl
from jax.experimental.pallas import tpu as pltpu

_LANE = 128
_MIB = 1024 * 1024
_MIN_KERNEL_ELEMS = 1 << 15      # below this, launch/reshape glue dominates -> XLA exp.


def _exp_kernel(x_ref, o_ref):
    # Pure elementwise transcendental -> EUP slot; whole-tile load/store.
    o_ref[...] = jnp.exp(x_ref[...])


@functools.lru_cache(maxsize=None)
def _tpu_profile():
    """Returns (num_tensorcores, tile_target_bytes, vmem_limit_bytes) for this chip."""
    vmem = 64 * _MIB          # conservative default (v7x-class per-TC VMEM)
    cores = None
    try:
        info = pltpu.get_tpu_info()
        v = getattr(info, "vmem_capacity_bytes", None)
        if isinstance(v, int) and v > 0:
            vmem = v
        for attr in ("num_tensorcores", "tensorcore_count", "num_cores", "core_count"):
            c = getattr(info, attr, None)
            if isinstance(c, int) and c > 0:
                cores = c
                break
    except Exception:
        pass
    if cores is None:
        # Heuristic: 64 MiB-per-TC generations (v7x) have 2 TCs/chip; 128 MiB ones have 1.
        cores = 2 if vmem <= 64 * _MIB else 1
    if vmem >= 128 * _MIB:
        tile_target, vmem_limit = 12 * _MIB, 64 * _MIB   # v5e / v6e: 4x12 = 48 MiB resident
    else:
        tile_target, vmem_limit = 8 * _MIB, 48 * _MIB    # v7x: 4x8 = 32 MiB resident
    return cores, tile_target, vmem_limit


def _pick_width(n: int):
    """Widest lane-dense width (multiple of 128) dividing n, preferring >= 8 rows."""
    widths = (2048, 1024, 512, 256, 128)
    for w in widths:
        if n % w == 0 and n // w >= 8:
            return w
    for w in widths:
        if n % w == 0:
            return w
    return None  # ragged: n is not a multiple of 128


def _round_down(x: int, m: int) -> int:
    return (x // m) * m


def exp_pallas(x: jax.Array, *, min_kernel_elems: int = _MIN_KERNEL_ELEMS,
               donate: bool = False) -> jax.Array:
    """Elementwise exp via a Pallas TPU kernel. Matches torch.exp forward semantics."""
    if jnp.issubdtype(x.dtype, jnp.complexfloating):
        # TODO(synk): complex exp has no clean Pallas TPU path; use fused XLA exp.
        return jnp.exp(x)
    if not jnp.issubdtype(x.dtype, jnp.floating):
        # torch.exp promotes integer/bool inputs to the default float dtype.
        x = x.astype(jnp.float32)
    if x.dtype.itemsize > 4:
        # float64 is unsupported by Pallas on TPU; fall back to XLA (also HBM-bound).
        return jnp.exp(x)

    n = x.size
    if n == 0 or n < min_kernel_elems:
        # Tiny tensors: reshape glue + kernel launch dominate; fused XLA exp is faster.
        return jnp.exp(x)

    width = _pick_width(n)
    if width is None:
        # Ragged (n % 128 != 0): padded-copy stitching would add O(n) HBM passes to an
        # HBM-bound op; a single fused XLA exp pass is strictly cheaper here.
        return jnp.exp(x)

    orig_shape = x.shape
    itemsize = jnp.dtype(x.dtype).itemsize
    rows = n // width
    x2d = jnp.reshape(x, (rows, width))

    num_cores, tile_target, vmem_limit = _tpu_profile()

    # Sublane granularity for this dtype's packing (f32: 8, bf16/f16: 16, 8-bit: 32).
    sub = 8 * max(1, 4 // itemsize)
    row_bytes = width * itemsize

    # Largest tile <= generation target (block == full rows is always legal).
    target_rows = max(sub, tile_target // row_bytes)
    block_rows = min(_round_down(target_rows, sub), rows)

    # Ensure >= 2 pipelined steps per TensorCore when tiles stay big enough
    # (don't shrink below ~2 MiB on single-TC chips / ~1 MiB on multi-TC chips).
    desired_steps = 2 * num_cores
    min_block_bytes = 1 * _MIB if num_cores > 1 else 2 * _MIB
    cap = _round_down(rows // desired_steps, sub)
    if cap >= sub and cap * row_bytes >= min_block_bytes:
        block_rows = min(block_rows, cap)
    # On multi-TC chips, at minimum give every core one step so both stream HBM.
    if num_cores > 1 and pl.cdiv(rows, block_rows) < num_cores:
        cap = _round_down(rows // num_cores, sub)
        if cap >= sub and cap * row_bytes >= 256 * 1024:
            block_rows = min(block_rows, cap)

    block_rows = max(1, min(block_rows, rows))
    grid = (pl.cdiv(rows, block_rows),)

    out2d = pl.pallas_call(
        _exp_kernel,
        out_shape=jax.ShapeDtypeStruct(x2d.shape, x2d.dtype),
        grid_spec=pltpu.PrefetchScalarGridSpec(
            num_scalar_prefetch=0,
            grid=grid,
            in_specs=[pl.BlockSpec((block_rows, width), lambda i: (i, 0))],
            out_specs=pl.BlockSpec((block_rows, width), lambda i: (i, 0)),
        ),
        compiler_params=pltpu.CompilerParams(
            dimension_semantics=("parallel",),
            vmem_limit_bytes=vmem_limit,
        ),
        input_output_aliases=({0: 0} if donate else {}),
    )(x2d)

    return jnp.reshape(out2d, orig_shape)


if __name__ == "__main__":
    key = jax.random.PRNGKey(0)
    k1, k2, k3 = jax.random.split(key, 3)

    # 1) Small NCHW input (matches the module's generic tensor input): fast path.
    x_small = jax.random.normal(k1, (2, 4, 16, 16), dtype=jnp.float32)
    y_small = exp_pallas(x_small)
    jax.block_until_ready(y_small)
    assert y_small.shape == x_small.shape and y_small.dtype == x_small.dtype
    assert jnp.allclose(y_small, jnp.exp(x_small), rtol=1e-6, atol=1e-6)

    # 2) Same small input, forced through the Pallas kernel path.
    y_small_k = exp_pallas(x_small, min_kernel_elems=0)
    jax.block_until_ready(y_small_k)
    assert jnp.allclose(y_small_k, jnp.exp(x_small), rtol=1e-6, atol=1e-6)

    # 3) Medium f32 input: default path goes through the kernel.
    x_med = jax.random.normal(k2, (4, 8, 64, 128), dtype=jnp.float32)
    y_med = exp_pallas(x_med)
    jax.block_until_ready(y_med)
    assert y_med.shape == x_med.shape and y_med.dtype == x_med.dtype
    assert jnp.allclose(y_med, jnp.exp(x_med), rtol=1e-6, atol=1e-6)

    # 3b) Same input with the aliased-output (donation-friendly) variant.
    y_med_d = exp_pallas(x_med, donate=True)
    jax.block_until_ready(y_med_d)
    assert jnp.allclose(y_med_d, jnp.exp(x_med), rtol=1e-6, atol=1e-6)

    # 4) Medium bf16 input through the kernel.
    x_bf16 = jax.random.normal(k3, (2, 8, 64, 128), dtype=jnp.bfloat16)
    y_bf16 = exp_pallas(x_bf16)
    jax.block_until_ready(y_bf16)
    assert y_bf16.shape == x_bf16.shape and y_bf16.dtype == jnp.bfloat16
    assert jnp.allclose(y_bf16.astype(jnp.float32),
                        jnp.exp(x_bf16).astype(jnp.float32), rtol=2e-2, atol=2e-2)

    # 5) Ragged size (n % 128 != 0): takes the single-pass XLA path.
    x_rag = jax.random.normal(k1, (3, 5, 7), dtype=jnp.float32)
    y_rag = exp_pallas(x_rag, min_kernel_elems=0)
    jax.block_until_ready(y_rag)
    assert jnp.allclose(y_rag, jnp.exp(x_rag), rtol=1e-6, atol=1e-6)

    # 6) Integer input: promoted to float32 like torch.exp.
    x_int = jnp.arange(2 * 4 * 8, dtype=jnp.int32).reshape(2, 4, 8) % 5
    y_int = exp_pallas(x_int)
    jax.block_until_ready(y_int)
    assert y_int.dtype == jnp.float32
    assert jnp.allclose(y_int, jnp.exp(x_int.astype(jnp.float32)), rtol=1e-6, atol=1e-6)

    print("KERNEL_OK")
</pallas_src>

<mosaic_0001>
module attributes {stable_mosaic.version = 11 : i64} {
  func.func @_exp_kernel(%arg0: i32, %arg1: memref<8x256xf32, #tpu.memory_space<vmem>>, %arg2: memref<8x256xf32, #tpu.memory_space<vmem>>) attributes {dimension_semantics = [#tpu.dimension_semantics<parallel>], iteration_bounds = array<i64: 1>, scalar_prefetch = 0 : i64, scratch_operands = 0 : i64, tpu.core_type = #tpu.core_type<tc>, window_params = [{transform_indices = @transform_0, window_bounds = array<i64: 8, 256>}, {transform_indices = @transform_1, window_bounds = array<i64: 8, 256>}]} {
    %c0 = arith.constant 0 : index
    %c0_0 = arith.constant 0 : index
    %0 = vector.load %arg1[%c0, %c0_0] : memref<8x256xf32, #tpu.memory_space<vmem>>, vector<8x256xf32>
    %1 = math.exp %0 : vector<8x256xf32>
    %c0_1 = arith.constant 0 : index
    %c0_2 = arith.constant 0 : index
    %2 = vector.load %arg2[%c0_1, %c0_2] : memref<8x256xf32, #tpu.memory_space<vmem>>, vector<8x256xf32>
    tpu.vector_store %arg2[%c0_1, %c0_2], %1 {strides = array<i32>} : memref<8x256xf32, #tpu.memory_space<vmem>>, vector<8x256xf32>,
    return
  }
  func.func @transform_0(%arg0: i32) -> (i32, i32) {
    %c0_i32 = arith.constant 0 : i32
    %c0_i32_0 = arith.constant 0 : i32
    return %arg0, %c0_i32 : i32, i32
  }
  func.func @transform_1(%arg0: i32) -> (i32, i32) {
    %c0_i32 = arith.constant 0 : i32
    %c0_i32_0 = arith.constant 0 : i32
    return %arg0, %c0_i32 : i32, i32
  }
}

</mosaic_0001>

<bundles_post_ra>
// kernel: tpu_custom_call.1
= control target key start
LH: loop header
LB: loop body
LE: loop exit
PB: predicated region body
PF: predicated region fallthrough
CT: control target
= control target key end

     0   :  { %6 = vsyncpa [#allocation3], 0  ;;  %s124_s0 = inlined_call_operand.hbm [shape: f32[8,256], index: 0, kind: input, shape index: {}]   ;;  %s125_s1 = inlined_call_operand.hbm [shape: f32[8,256], index: 1, kind: output, shape index: {}]  }
   0x1   :  { %7 = vsyncpa [#allocation4], 0  ;;  %s13_s8 = sshll.u32 %s124_s0, 4  ;;  %s106_s9 = smov [#allocation2]   ;;  %s14_s8 = int_to_ptr.hbm [resolvable:$true] %s13_s8 }
   0x2   :  { %s15_s10 = sshll.u32 %s106_s9, 4  ;;  %s16_s10 = int_to_ptr.vmem [resolvable:$true] %s15_s10 }
   0x3   :  { %18 = dma.hbm_to_vmem [thread:$0]  %s14_s8, 256, %s16_s10, [#allocation3]  }
   0x4   :  { %102 = dma.done.wait [#allocation3], 256  }
   0x5   :  { %103 = vsyncadd [#allocation3], 4294967040  ;;  %v23_v0 = vld [vmem:[#allocation2] sm:$0xff]  ;;  %v24_v1 = vld [vmem:[#allocation2 + $0x8] sm:$0xff]  ;;  %s107_s11 = smov [#allocation5]   ;;  %s38_s15 = sshll.u32 %s125_s1, 4  ;;  %s39_s15 = int_to_ptr.hbm [resolvable:$true] %s38_s15 }
   0x6   :  { %v25_v2 = vmul.f32 1.442695, %v23_v0  ;;  %v27_v3 = vmul.f32 1.442695, %v24_v1  ;;  %s36_s12 = sshll.u32 %s107_s11, 4  ;;  %s37_s12 = int_to_ptr.vmem [resolvable:$true] %s36_s12 }
   0x8   :  { %50 = vpow2.f32 %v25_v2 }
   0x9   :  { %52 = vpow2.f32 %v27_v3 }
   0xe   :  { %v51_v4 = vpop.eup %50 }
   0xf   :  { %v53_v5 = vpop.eup %52  ;;  %29 = vst [vmem:[#allocation5] sm:$0xff] %v51_v4 }
  0x10   :  { %30 = vst [vmem:[#allocation5 + $0x8] sm:$0xff] %v53_v5 }
  0x11   :  { %41 = dma.vmem_to_hbm [thread:$0]  %s37_s12, 256, %s39_s15, [#allocation4]  }
  0x12   :  { %104 = dma.done.wait [#allocation4], 256  }
  0x13   :  { %105 = vsyncadd [#allocation4], 4294967040 }
  0x14   :  { %46 = vsyncpa [#allocation3], 1 }
  0x15   :  { %47 = vsyncpa [#allocation4], 1 }

</bundles_post_ra>
